<compile_context>
chip_gen: v6e
topology: v6e:2x2x1
jax: 0.10.0
libtpu: 0.0.40
codegen_flags: <defaults>
</compile_context>

<pallas_src>
import functools

import jax
import jax.numpy as jnp
from jax.experimental import pallas as pl
from jax.experimental.pallas import tpu as pltpu
import numpy as np


_MXU_CHANNEL_THRESHOLD = 16  # below this, do the 1x1 conv as VPU broadcast-FMA


def _pixel_attention_kernel(x_ref, w_ref, bias_ref, out_ref, *, use_mxu):
    """One (image, spatial-tile) per grid step.

    x_ref:    (1, C, T)  lane-dense activation tile (T = spatial tile, mult of 128)
    w_ref:    (C, C)     1x1 conv weight with BN scale folded in, (c_out, c_in)
    bias_ref: (C, 1)     folded conv-bias + BN shift
    out_ref:  (1, C, T)  gated output x * sigmoid(BN(conv(x)))
    """
    x = x_ref[0].astype(jnp.float32)          # (C, T)
    w = w_ref[...].astype(jnp.float32)        # (C_out, C_in), scale already folded

    if use_mxu:
        # Single contraction over channels on the MXU.
        pre = jnp.dot(w, x, preferred_element_type=jnp.float32)    # (C, T)
    else:
        # Tiny channel count: skip the MXU, do C broadcast-FMAs on the VPU
        # over the lane-dense tile.
        cin = w.shape[1]
        pre = w[:, 0:1] * x[0:1, :]                                 # (C, T)
        for ci in range(1, cin):
            pre = pre + w[:, ci:ci + 1] * x[ci:ci + 1, :]

    pre = pre + bias_ref[...]                                       # folded bias
    attn = 1.0 / (1.0 + jnp.exp(-pre))                              # sigmoid (EUP)
    out_ref[0] = (x * attn).astype(out_ref.dtype)                   # gate


def _pick_tile_hw(hw, max_tile):
    """Largest multiple-of-128 divisor of hw that is <= max_tile (else hw)."""
    if hw <= max_tile:
        return hw
    if hw % 128 != 0:
        return hw
    t = (max_tile // 128) * 128
    while t >= 128:
        if hw % t == 0:
            return t
        t -= 128
    return hw


def pixel_attention(x_nchw, params, *, max_tile_hw=2048):
    """Forward pass of PixelAttention: x * sigmoid(BN(Conv1x1(x))).  NCHW in/out."""
    N, C, H, W = x_nchw.shape
    HW = H * W
    x_flat = x_nchw.reshape(N, C, HW)          # free contiguous reshape, no copy

    # Fold inference-mode BN into the conv (exact):
    #   BN(Wx + b) = scale * (Wx + b - mean) + beta
    #              = (scale*W) x + (scale*(b - mean) + beta)
    eps = params["eps"]
    scale = params["gamma"] / jnp.sqrt(params["running_var"] + eps)          # (C,)
    w_folded = params["w"] * scale[:, None]                                  # (C, C)
    bias_folded = ((params["conv_b"] - params["running_mean"]) * scale
                   + params["beta"]).reshape(C, 1)                           # (C, 1)

    T = _pick_tile_hw(HW, max_tile_hw)
    grid = (N, HW // T)

    use_mxu = C >= _MXU_CHANNEL_THRESHOLD
    kernel = functools.partial(_pixel_attention_kernel, use_mxu=use_mxu)

    out_flat = pl.pallas_call(
        kernel,
        out_shape=jax.ShapeDtypeStruct((N, C, HW), x_nchw.dtype),
        grid_spec=pltpu.PrefetchScalarGridSpec(
            num_scalar_prefetch=0,
            grid=grid,
            in_specs=[
                pl.BlockSpec((1, C, T), lambda n, t: (n, 0, t)),
                pl.BlockSpec((C, C), lambda n, t: (0, 0)),
                pl.BlockSpec((C, 1), lambda n, t: (0, 0)),
            ],
            out_specs=pl.BlockSpec((1, C, T), lambda n, t: (n, 0, t)),
        ),
        compiler_params=pltpu.CompilerParams(
            dimension_semantics=("parallel", "parallel")),
    )(x_flat, w_folded, bias_folded)

    return out_flat.reshape(N, C, H, W)


def init_params(key, channels, eps=1e-5):
    """Deterministic synthetic raw parameters: Conv2d(1x1) + BatchNorm2d (inference)."""
    kw, kb, kg, kbt = jax.random.split(key, 4)
    # Conv2d(channels, channels, 1) weight (Cout, Cin, 1, 1) -> (Cout, Cin).
    w = jax.random.normal(kw, (channels, channels), jnp.float32) * 0.1
    conv_b = jax.random.normal(kb, (channels,), jnp.float32) * 0.1
    gamma = 1.0 + 0.1 * jax.random.normal(kg, (channels,), jnp.float32)
    beta = 0.1 * jax.random.normal(kbt, (channels,), jnp.float32)
    running_mean = jnp.zeros((channels,), jnp.float32)
    running_var = jnp.ones((channels,), jnp.float32)
    # NOTE: f32 I/O to match the PyTorch-default reference exactly; for production,
    # casting x / w to bf16 (keeping the f32 accumulate) halves HBM traffic.
    return dict(w=w, conv_b=conv_b, gamma=gamma, beta=beta,
                running_mean=running_mean, running_var=running_var, eps=eps)


def _reference(x_nchw, p):
    """Pure-JAX reference from RAW params: x * sigmoid(BN(Conv1x1(x)))."""
    pre = jnp.einsum("oc,nchw->nohw", p["w"], x_nchw) + p["conv_b"].reshape(1, -1, 1, 1)
    scale = p["gamma"] / jnp.sqrt(p["running_var"] + p["eps"])
    pre = (pre - p["running_mean"].reshape(1, -1, 1, 1)) * scale.reshape(1, -1, 1, 1) \
        + p["beta"].reshape(1, -1, 1, 1)
    attn = 1.0 / (1.0 + jnp.exp(-pre))
    return x_nchw * attn


if __name__ == "__main__":
    key = jax.random.PRNGKey(0)

    # Config 1: tiny channels (VPU broadcast-FMA path), like the example shapes.
    N, C, H, W = 2, 4, 16, 16
    kx, kp = jax.random.split(key)
    x = jax.random.normal(kx, (N, C, H, W), jnp.float32)   # NCHW, like PyTorch
    params = init_params(kp, C)

    out = jax.block_until_ready(pixel_attention(x, params))
    ref = _reference(x, params)
    np.testing.assert_allclose(np.asarray(out), np.asarray(ref),
                               rtol=1e-4, atol=1e-4)
    assert out.shape == (N, C, H, W)

    # Config 2: wider channels -> single fused MXU matmul path.
    C2 = 32
    kx2, kp2 = jax.random.split(jax.random.fold_in(key, 1))
    x2 = jax.random.normal(kx2, (N, C2, H, W), jnp.float32)
    params2 = init_params(kp2, C2)

    out2 = jax.block_until_ready(pixel_attention(x2, params2))
    ref2 = _reference(x2, params2)
    np.testing.assert_allclose(np.asarray(out2), np.asarray(ref2),
                               rtol=1e-4, atol=1e-4)
    assert out2.shape == (N, C2, H, W)

    print("KERNEL_OK")
</pallas_src>

<mosaic_0001>
module attributes {stable_mosaic.version = 11 : i64} {
  func.func @_pixel_attention_kernel(%arg0: i32, %arg1: i32, %arg2: memref<1x4x256xf32, #tpu.memory_space<vmem>>, %arg3: memref<4x4xf32, #tpu.memory_space<vmem>>, %arg4: memref<4x1xf32, #tpu.memory_space<vmem>>, %arg5: memref<1x4x256xf32, #tpu.memory_space<vmem>>) attributes {dimension_semantics = [#tpu.dimension_semantics<parallel>, #tpu.dimension_semantics<parallel>], iteration_bounds = array<i64: 2, 1>, scalar_prefetch = 0 : i64, scratch_operands = 0 : i64, tpu.core_type = #tpu.core_type<tc>, window_params = [{transform_indices = @transform_0, window_bounds = array<i64: 1, 4, 256>}, {pipeline_mode = #tpu.pipeline_mode<synchronous>, transform_indices = @transform_1, window_bounds = array<i64: 4, 4>}, {pipeline_mode = #tpu.pipeline_mode<synchronous>, transform_indices = @transform_2, window_bounds = array<i64: 4, 1>}, {transform_indices = @transform_3, window_bounds = array<i64: 1, 4, 256>}]} {
    %c0 = arith.constant 0 : index
    %c0_0 = arith.constant 0 : index
    %c0_1 = arith.constant 0 : index
    %0 = vector.load %arg2[%c0, %c0_0, %c0_1] : memref<1x4x256xf32, #tpu.memory_space<vmem>>, vector<1x4x256xf32>
    %1 = vector.shape_cast %0 : vector<1x4x256xf32> to vector<4x256xf32>
    %c0_2 = arith.constant 0 : index
    %c0_3 = arith.constant 0 : index
    %2 = vector.load %arg3[%c0_2, %c0_3] : memref<4x4xf32, #tpu.memory_space<vmem>>, vector<4x4xf32>
    %3 = vector.extract_strided_slice %2 {offsets = [0, 0], sizes = [4, 1], strides = [1, 1]} : vector<4x4xf32> to vector<4x1xf32>
    %4 = vector.extract_strided_slice %1 {offsets = [0, 0], sizes = [1, 256], strides = [1, 1]} : vector<4x256xf32> to vector<1x256xf32>
    %5 = vector.broadcast %3 : vector<4x1xf32> to vector<4x256xf32>
    %6 = vector.broadcast %4 : vector<1x256xf32> to vector<4x256xf32>
    %7 = arith.mulf %5, %6 : vector<4x256xf32>
    %8 = vector.extract_strided_slice %2 {offsets = [0, 1], sizes = [4, 1], strides = [1, 1]} : vector<4x4xf32> to vector<4x1xf32>
    %9 = vector.extract_strided_slice %1 {offsets = [1, 0], sizes = [1, 256], strides = [1, 1]} : vector<4x256xf32> to vector<1x256xf32>
    %10 = vector.broadcast %8 : vector<4x1xf32> to vector<4x256xf32>
    %11 = vector.broadcast %9 : vector<1x256xf32> to vector<4x256xf32>
    %12 = arith.mulf %10, %11 : vector<4x256xf32>
    %13 = arith.addf %7, %12 : vector<4x256xf32>
    %14 = vector.extract_strided_slice %2 {offsets = [0, 2], sizes = [4, 1], strides = [1, 1]} : vector<4x4xf32> to vector<4x1xf32>
    %15 = vector.extract_strided_slice %1 {offsets = [2, 0], sizes = [1, 256], strides = [1, 1]} : vector<4x256xf32> to vector<1x256xf32>
    %16 = vector.broadcast %14 : vector<4x1xf32> to vector<4x256xf32>
    %17 = vector.broadcast %15 : vector<1x256xf32> to vector<4x256xf32>
    %18 = arith.mulf %16, %17 : vector<4x256xf32>
    %19 = arith.addf %13, %18 : vector<4x256xf32>
    %20 = vector.extract_strided_slice %2 {offsets = [0, 3], sizes = [4, 1], strides = [1, 1]} : vector<4x4xf32> to vector<4x1xf32>
    %21 = vector.extract_strided_slice %1 {offsets = [3, 0], sizes = [1, 256], strides = [1, 1]} : vector<4x256xf32> to vector<1x256xf32>
    %22 = vector.broadcast %20 : vector<4x1xf32> to vector<4x256xf32>
    %23 = vector.broadcast %21 : vector<1x256xf32> to vector<4x256xf32>
    %24 = arith.mulf %22, %23 : vector<4x256xf32>
    %25 = arith.addf %19, %24 : vector<4x256xf32>
    %c0_4 = arith.constant 0 : index
    %c0_5 = arith.constant 0 : index
    %26 = vector.load %arg4[%c0_4, %c0_5] : memref<4x1xf32, #tpu.memory_space<vmem>>, vector<4x1xf32>
    %27 = vector.broadcast %26 : vector<4x1xf32> to vector<4x256xf32>
    %28 = arith.addf %25, %27 : vector<4x256xf32>
    %cst = arith.constant 0.000000e+00 : f32
    %29 = vector.broadcast %cst : f32 to vector<4x256xf32>
    %30 = arith.subf %29, %28 : vector<4x256xf32>
    %31 = math.exp %30 : vector<4x256xf32>
    %cst_6 = arith.constant 1.000000e+00 : f32
    %32 = vector.broadcast %cst_6 : f32 to vector<4x256xf32>
    %33 = arith.addf %32, %31 : vector<4x256xf32>
    %cst_7 = arith.constant 1.000000e+00 : f32
    %34 = vector.broadcast %cst_7 : f32 to vector<4x256xf32>
    %35 = arith.divf %34, %33 : vector<4x256xf32>
    %36 = arith.mulf %1, %35 : vector<4x256xf32>
    %c0_8 = arith.constant 0 : index
    %c0_9 = arith.constant 0 : index
    %c0_10 = arith.constant 0 : index
    %37 = vector.load %arg5[%c0_8, %c0_9, %c0_10] : memref<1x4x256xf32, #tpu.memory_space<vmem>>, vector<1x4x256xf32>
    %38 = vector.shape_cast %37 : vector<1x4x256xf32> to vector<4x256xf32>
    %39 = vector.shape_cast %36 : vector<4x256xf32> to vector<1x4x256xf32>
    tpu.vector_store %arg5[%c0_8, %c0_9, %c0_10], %39 {strides = array<i32>} : memref<1x4x256xf32, #tpu.memory_space<vmem>>, vector<1x4x256xf32>,
    return
  }
  func.func @transform_0(%arg0: i32, %arg1: i32) -> (i32, i32, i32) {
    %c0_i32 = arith.constant 0 : i32
    %c0_i32_0 = arith.constant 0 : i32
    return %arg0, %c0_i32, %arg1 : i32, i32, i32
  }
  func.func @transform_1(%arg0: i32, %arg1: i32) -> (i32, i32) {
    %c0_i32 = arith.constant 0 : i32
    %c0_i32_0 = arith.constant 0 : i32
    %c0_i32_1 = arith.constant 0 : i32
    return %c0_i32, %c0_i32_0 : i32, i32
  }
  func.func @transform_2(%arg0: i32, %arg1: i32) -> (i32, i32) {
    %c0_i32 = arith.constant 0 : i32
    %c0_i32_0 = arith.constant 0 : i32
    %c0_i32_1 = arith.constant 0 : i32
    return %c0_i32, %c0_i32_0 : i32, i32
  }
  func.func @transform_3(%arg0: i32, %arg1: i32) -> (i32, i32, i32) {
    %c0_i32 = arith.constant 0 : i32
    %c0_i32_0 = arith.constant 0 : i32
    return %arg0, %c0_i32, %arg1 : i32, i32, i32
  }
}

</mosaic_0001>

<bundles_post_ra>
// kernel: tpu_custom_call.1
= control target key start
LH: loop header
LB: loop body
LE: loop exit
PB: predicated region body
PF: predicated region fallthrough
CT: control target
= control target key end

     0   :  { %8 = vsyncpa [#allocation3], 0  ;;  %s817_s0 = inlined_call_operand.hbm [shape: f32[2,4,256], index: 0, kind: input, shape index: {}]   ;;  %s818_s1 = inlined_call_operand.vmem [shape: f32[4,4], index: 1, kind: input, shape index: {}]   ;;  %s819_s2 = inlined_call_operand.vmem [shape: f32[4,1], index: 2, kind: input, shape index: {}]   ;;  %s820_s3 = inlined_call_operand.hbm [shape: f32[2,4,256], index: 3, kind: output, shape index: {}]  }
   0x1   :  { %10 = vsyncpa [#allocation3 + $0x1], 0 }
   0x2   :  { %11 = vsyncpa [#allocation4], 0 }
   0x3   :  { %13 = vsyncpa [#allocation4 + $0x1], 0  ;;  %s673_s12 = smov 0   ;;  %s675_s13 = smov 0  }
   0x4   :  { %s677_s14 = smov 0   ;;  %s679_s15 = smov 0  }
   0x5   :  { %s681_s16 = smov 0   ;;  %s683_s17 = smov 0  }
   0x6 LB: > { %s440_s18 = sadd.s32 4294967295, %s645_s17   ;;  %s441_s19 = sadd.s32 4294967294, %s645_s17   ;;  %s645_s17 = sphi %s683_s17, %s19_s17   ;;  %s641_s16 = sphi %s681_s16, %s832_s16   ;;  %s637_s15 = sphi %s679_s15, %s831_s15   ;;  %s633_s14 = sphi %s677_s14, %s830_s14   ;;  %s629_s13 = sphi %s675_s13, %s829_s13   ;;  %s625_s12 = sphi %s673_s12, %s828_s12  }
   0x7   : > { %s31_s20 = sadd.s32 1, %s641_s16  ;;  %s40_s21 = sadd.s32 1, %s633_s14 }
   0x8   : > { %p33_p0 = scmp.ge.s32.totalorder %s31_s20, 2  ;;  %p47_p1 = scmp.ne.s32.totalorder %s633_s14, %s629_s13 }
   0x9   : > { %p48_p2 = scmp.eq.s32.totalorder %s645_s17, 0  ;;  %p53_p3 = scmp.ne.s32.totalorder %s629_s13, %s625_s12 }
   0xa   : > { %s834_s20 = smov (%p33_p0, %s31_s20), 0  ;;  %p54_p5 = scmp.eq.s32.totalorder %s440_s18, 0 }
   0xb   : > { %p714_p4 = por %p48_p2, %p47_p1  ;;  %s35_s23 = ssub.s32 %s641_s16, %s834_s20 }
   0xc   : > { %p121_p6 = scmp.eq.s32.totalorder %s440_s18, 1  ;;  %p38_p7 = scmp.eq.s32.totalorder %s35_s23, 0 }
   0xd   : > { %p720_p8 = por %p54_p5, %p53_p3  ;;  %p127_p10 = scmp.eq.s32.totalorder %s441_s19, 1 }
   0xe   : > { %p724_p9 = por %p121_p6, %p47_p1  ;;  %p469_p13 = scmp.lt.s32.totalorder %s645_s17, 2 }
   0xf   : > { %s729_s26 = scalar_select %p38_p7, %s633_s14, %s40_s21  }
  0x10   : > { %p731_p11 = por %p127_p10, %p53_p3  ;;  %s153_s28 = sand.u32 1, %s633_s14  }
  0x11   : > { %s444_s29 = sshll.u32 %s153_s28, 3  ;;  %s455_s30 = sshll.u32 %s641_s16, 7 }
  0x12   : > { %s824_s27 = scalar_select %p731_p11, 1, 0 }
  0x13   : > { %s165_s6 = scalar_lea.hbm %s817_s0, %s455_s30  ;;  %s157_s7 = scalar_lea.vmem [#allocation2], %s444_s29 }
  0x14   : > { %s167_s8 = sshll.u32 %s157_s7, 4  ;;  %p744_p0 = pnand %p469_p13, %p714_p4  ;;  %s168_s8 = int_to_ptr.vmem [resolvable:$true] %s167_s8 }
  0x15   : > { %p447_p1 = scmp.ge.s32.totalorder %s645_s17, 1  ;;  %p172_p2 = scmp.lt.s32.totalorder %s645_s17, 3 }
  0x16   : > { %s154_s10 = scalar_lea.sflag [#allocation3], %s153_s28  ;;  %p539_p3 = pneg %p744_p0 }
  0x17   : > { %s550_s11 = scalar_lea.vmem %s168_s8, 128  ;;  %s647_s18 = smov [#allocation2]  }
  0x18   : > { %p551_p5 = scmp.ne.s32.totalorder %s168_s8, %s550_s11  ;;  %s555_s19 = sshll.u32 %s647_s18, 4  ;;  %s556_s19 = int_to_ptr.vmem [resolvable:$false] %s555_s19 }
  0x19   : > { %s557_s21 = scalar_lea.vmem %s556_s19, 256  ;;  %p558_p10 = scmp.lt.s32.totalorder %s168_s8, %s556_s19 }
  0x1a   : > { %p553_p6 = pnand %p551_p5, %p539_p3  ;;  %p559_p12 = scmp.lt.s32.totalorder %s557_s21, %s550_s11 }
  0x1c   : > { %p554_p7 = pneg %p553_p6  ;;  %p560_p4 = por %p559_p12, %p558_p10 }
  0x1e   : > { %p561_p13 = pnand %p560_p4, %p554_p7 }
  0x20   : > { %564 = shalt.err (!%p561_p13)
}
  0x21   : > { %464 = dma.hbm_to_vmem [thread:$0]  (!%p744_p0), %s165_s6, 128, %s168_s8, %s154_s10  }
  0x22   : > { %p173_p11 = pnand %p447_p1, %p172_p2 }
  0x23   : > { %s759_s22 = sand.u32 (!%p173_p11), 1, %s629_s13  }
  0x24   : > { %176 = sbr.rel (%p173_p11) target bundleno = 235 (0xeb), region = 32  ;;  %s448_s23 = sshll.u32 (!%p173_p11), %s759_s22, 3 }
  0x25   : > { %s179_s28 = scalar_lea.sflag (!%p173_p11), [#allocation3], %s759_s22  ;;  %s182_s29 = scalar_lea.vmem (!%p173_p11), [#allocation2], %s448_s23 }
  0x29   : > { %616 = dma.done.wait (%p720_p8), %s179_s28, 128  }
  0x2a   : > { %618 = vsyncadd (%p720_p8), %s179_s28, 4294967168  ;;  %v648_v0 = vmov 0   ;;  %v649_v1 = vmov 2   ;;  %v208_v2 = vld [vmem:[%s818_s1] sm:$0xf]  ;;  %v650_v3 = vmov 1   ;;  %v215_v6 = vlaneseq }
  0x2b   : > { %523 = vset.pattern.permute.xlu0 %v648_v0  ;;  %525 = vset.pattern.permute.xlu1 %v649_v1  ;;  %v651_v4 = vmov 3   ;;  %v313_v5 = vld [vmem:[%s819_s2] sm:$0xf]  ;;  %s456_s24 = sshll.u32 %s637_s15, 7  ;;  %s204_s7 = scalar_lea.vmem [#allocation5], %s448_s23 }
  0x2c   : > { %211 = vperm.xlu0 %523, %v208_v2   ;;  %262 = vperm.xlu1 %525, %v208_v2   ;;  %v216_v7 = vshrl.u32 %v215_v6, 7  ;;  %v207_v12 = vld [vmem:[%s182_s29] sm:$0xff]  ;;  %s356_s8 = sshll.u32 %s204_s7, 4  ;;  %s354_s11 = scalar_lea.hbm %s820_s3, %s456_s24  ;;  %s357_s8 = int_to_ptr.vmem [resolvable:$true] %s356_s8 }
  0x2d   : > { %s340_s18 = scalar_lea.sflag [#allocation4], %s759_s22  ;;  %s565_s19 = scalar_lea.vmem %s357_s8, 128 }
  0x2e   : > { %v217_v8 = vsub.s32 0, %v216_v7  ;;  %v221_v9 = vsub.s32 4, %v216_v7  ;;  %v241_v10 = vsub.s32 1, %v216_v7  ;;  %v245_v11 = vsub.s32 5, %v216_v7  ;;  %p566_p8 = scmp.ne.s32.totalorder %s357_s8, %s565_s19  ;;  %s652_s21 = smov [#allocation5]  }
  0x2f   : > { %v267_v13 = vsub.s32 2, %v216_v7  ;;  %v271_v14 = vsub.s32 6, %v216_v7  ;;  %v293_v15 = vsub.s32 3, %v216_v7  ;;  %v297_v16 = vsub.s32 7, %v216_v7  ;;  %s569_s28 = sshll.u32 %s652_s21, 4  ;;  %s570_s28 = int_to_ptr.vmem [resolvable:$false] %s569_s28 }
  0x30   : > { %524 = vset.pattern.permute.xlu0 %v650_v3  ;;  %526 = vset.pattern.permute.xlu1 %v651_v4  ;;  %v218_v17 = vrot.slane %v207_v12, %v217_v8  ;;  %v222_v18 = vrot.slane %v207_v12, %v221_v9  ;;  %v242_v19 = vrot.slane %v207_v12, %v241_v10  ;;  %p567_p11 = pnand %p566_p8, %p724_p9  ;;  %s571_s15 = scalar_lea.vmem %s570_s28, 256 }
  0x31   : > { %236 = vperm.xlu0 %524, %v208_v2   ;;  %288 = vperm.xlu1 %526, %v208_v2   ;;  %v246_v20 = vrot.slane %v207_v12, %v245_v11  ;;  %v268_v21 = vrot.slane %v207_v12, %v267_v13  ;;  %v272_v22 = vrot.slane %v207_v12, %v271_v14  ;;  %p572_p0 = scmp.lt.s32.totalorder %s357_s8, %s570_s28  ;;  %p573_p1 = scmp.lt.s32.totalorder %s571_s15, %s565_s19 }
  0x32   : > { %v294_v25 = vrot.slane %v207_v12, %v293_v15  ;;  %v298_v26 = vrot.slane %v207_v12, %v297_v16  ;;  %v228_v27 = vrot.slane %v218_v17, %v217_v8  ;;  %v232_v28 = vrot.slane %v222_v18, %v217_v8  ;;  %p568_p12 = pneg %p567_p11 }
  0x33   : > { %v252_v29 = vrot.slane %v242_v19, %v241_v10  ;;  %v256_v30 = vrot.slane %v246_v20, %v241_v10  ;;  %v278_v31 = vrot.slane %v268_v21, %v267_v13  ;;  %v282_v32 = vrot.slane %v272_v22, %v267_v13  ;;  %p574_p2 = por %p573_p1, %p572_p0 }
  0x34   : > { %v304_v33 = vrot.slane %v294_v25, %v293_v15  ;;  %v308_v34 = vrot.slane %v298_v26, %v293_v15 }
  0x35   : > { %527 = vset.pattern.permute.xlu1 %v648_v0  ;;  %528 = vset.pattern.permute.xlu0 %v648_v0  ;;  %p575_p3 = pnand %p574_p2, %p568_p12 }
  0x36   : > { %316 = vperm.xlu1 %527, %v313_v5  }
  0xa7   : > { %v212_v23 = vpop.permute.xlu0 %211  ;;  %v263_v24 = vpop.permute.xlu1 %262 }
  0xa8   : > { %v233_v37 = vmul.f32 %v228_v27, %v212_v23  ;;  %v234_v38 = vmul.f32 %v232_v28, %v212_v23  ;;  %v283_v41 = vmul.f32 %v278_v31, %v263_v24  ;;  %v284_v42 = vmul.f32 %v282_v32, %v263_v24 }
  0xac   : > { %v237_v35 = vpop.permute.xlu0 %236  ;;  %v289_v36 = vpop.permute.xlu1 %288 }
  0xad   : > { %v257_v39 = vmul.f32 %v252_v29, %v237_v35  ;;  %v258_v40 = vmul.f32 %v256_v30, %v237_v35  ;;  %v309_v45 = vmul.f32 %v304_v33, %v289_v36  ;;  %v310_v46 = vmul.f32 %v308_v34, %v289_v36 }
  0xaf   : > { %v259_v43 = vadd.f32 %v257_v39, %v233_v37  ;;  %v260_v44 = vadd.f32 %v258_v40, %v234_v38 }
  0xb1   : > { %v285_v47 = vadd.f32 %v283_v41, %v259_v43  ;;  %v286_v48 = vadd.f32 %v284_v42, %v260_v44  ;;  %v317_v49 = vpop.permute.xlu1 %316 }
  0xb3   : > { %v311_v50 = vadd.f32 %v309_v45, %v285_v47  ;;  %v312_v51 = vadd.f32 %v310_v46, %v286_v48 }
  0xb5   : > { %v319_v52 = vadd.f32 %v317_v49, %v311_v50  ;;  %v320_v53 = vadd.f32 %v317_v49, %v312_v51 }
  0xb7   : > { %v321_v54 = vsub.f32 0.0, %v319_v52  ;;  %v322_v55 = vsub.f32 0.0, %v320_v53 }
  0xb9   : > { %v323_v56 = vmul.f32 1.442695, %v321_v54  ;;  %v325_v57 = vmul.f32 1.442695, %v322_v55 }
  0xbb   : > { %529 = vpow2.f32 %v323_v56 }
  0xbc   : > { %531 = vpow2.f32 %v325_v57 }
  0xc8   : > { %v530_v58 = vpop.eup %529 }
  0xc9   : > { %v532_v59 = vpop.eup %531  ;;  %v327_v60 = vadd.f32 1.0, %v530_v58 }
  0xca   : > { %v328_v61 = vadd.f32 1.0, %v532_v59 }
  0xcb   : > { %533 = vrcp.f32 %v327_v60 }
  0xcc   : > { %535 = vrcp.f32 %v328_v61 }
  0xd8   : > { %v534_v62 = vpop.eup %533 }
  0xd9   : > { %v536_v63 = vpop.eup %535 }
  0xda   : > { %v335_v0 = vcombine.low %v534_v62, %v536_v63 }
  0xdc   : > { %v337_v1 = vmul.f32 %v335_v0, %v207_v12 }
  0xde   : > { %338 = vst [vmem:[%s204_s7] sm:$0xff] %v337_v1 }
  0xdf   : > { %578 = shalt.err (!%p575_p3)
}
  0xe0   : > { %s579_s23 = scalar_lea.hbm %s354_s11, 128  ;;  %s583_s30 = scalar_lea.hbm %s820_s3, 256 }
  0xe1   : > { %p580_p5 = scmp.ne.s32.totalorder %s354_s11, %s579_s23  ;;  %p584_p10 = scmp.lt.s32.totalorder %s354_s11, %s820_s3 }
  0xe2   : > { %p585_p4 = scmp.lt.s32.totalorder %s583_s30, %s579_s23 }
  0xe3   : > { %p581_p6 = pnand %p580_p5, %p724_p9 }
  0xe4   : > { %p586_p13 = por %p585_p4, %p584_p10 }
  0xe5   : > { %p582_p7 = pneg %p581_p6 }
  0xe7   : > { %p587_p8 = pnand %p586_p13, %p582_p7 }
  0xe9   : > { %590 = shalt.err (!%p587_p8)
}
  0xea   : > { %459 = dma.vmem_to_hbm [thread:$0]  (%p724_p9), %s357_s8, 128, %s354_s11, %s340_s18  }
  0xeb PF: > { %s368_s6 = sand.u32 1, %s625_s12   ;;  %p826_p11 = scmp.ne.s32.totalorder %s824_s27, 0 }
  0xec   : > { %p827_p12 = scmp.ge.s32.totalorder %s645_s17, 2  ;;  %s369_s24 = scalar_lea.sflag [#allocation4], %s368_s6 }
  0xee   : > { %p466_p0 = pnand %p827_p12, %p826_p11 }
  0xf0   : > { %p467_p1 = pneg %p466_p0 }
  0xf2   : > { %620 = dma.done.wait (%p467_p1), %s369_s24, 128  }
  0xf3   : > { %622 = vsyncadd (%p467_p1), %s369_s24, 4294967168  ;;  %s19_s17 = sadd.s32 1, %s645_s17   ;;  %s828_s12 = smov %s629_s13 }
  0xf4   : > { %p16_p2 = scmp.ge.s32.totalorder %s19_s17, 4   ;;  %s829_s13 = smov %s633_s14 }
  0xf5   : > { %s830_s14 = smov %s729_s26  ;;  %s831_s15 = smov %s641_s16 }
  0xf6   : > { %s832_s16 = smov %s834_s20  ;;  %18 = sbr.rel (!%p16_p2) target bundleno = 6 (0x6), region = 77 }
  0xfb   :  { %374 = vsyncpa [#allocation3], 1 }
  0xfc   :  { %376 = vsyncpa [#allocation3 + $0x1], 1 }
  0xfd   :  { %377 = vsyncpa [#allocation4], 1 }
  0xfe   :  { %379 = vsyncpa [#allocation4 + $0x1], 1 }

</bundles_post_ra>
